<compile_context>
chip_gen: v6e
topology: v6e:2x2x1
jax: 0.10.0
libtpu: 0.0.40
codegen_flags: <defaults>
</compile_context>

<pallas_src>
import math

import jax
import jax.numpy as jnp
from jax.experimental import pallas as pl
from jax.experimental.pallas import tpu as pltpu


# --------------------------------------------------------------------------
# Kernel body (shared by both paths; mask block broadcasts over coil axis in
# the coil path, is same-shaped in the generic path).
# --------------------------------------------------------------------------
def _dc_kernel(mask_ref, samp_ref, pred_ref, out_ref):
    m = mask_ref[...]
    out_ref[...] = m * samp_ref[...] + (1.0 - m) * pred_ref[...]


# --------------------------------------------------------------------------
# Tiling helpers
# --------------------------------------------------------------------------
def _vmem_budget(num_block_buffers):
    """(vmem_limit_bytes, max_block_bytes) sized per TPU generation."""
    try:
        cap = int(pltpu.get_tpu_info().vmem_capacity_bytes)
    except Exception:
        cap = 64 << 20  # conservative (v7x-sized) fallback
    vmem_limit = min(64 << 20, max(32 << 20, cap // 2))
    max_block_bytes = max(128 * 8 * 4, (vmem_limit * 7 // 8) // num_block_buffers)
    return vmem_limit, max_block_bytes


def _pick_lane_tile(lane, padded_rows, itemsize, max_block_bytes, min_lane_tiles=1):
    """Largest 128-multiple lane tile fitting the (sublane-padded) block budget."""
    if lane < 128:
        return lane  # full-extent lane block (legal) for tiny lanes
    units = max(1, min(pl.cdiv(lane, 128),
                       max_block_bytes // (padded_rows * 128 * itemsize)))
    lt = units * 128
    # Guarantee >= min_lane_tiles grid steps (v7x has 2 TensorCores).
    if (min_lane_tiles > 1 and pl.cdiv(lane, lt) < min_lane_tiles
            and lane >= min_lane_tiles * 128):
        lt = max(128, pl.cdiv(pl.cdiv(lane, min_lane_tiles), 128) * 128)
    return lt


def _factor_2d(shape):
    """Split a tensor into (rows, lane): lane collects trailing dims (lane-dense)
    while keeping rows >= 8 (sublane-dense) whenever the tensor is big enough."""
    total = math.prod(shape)
    lane = 1
    i = len(shape)
    while i > 1:
        nxt = lane * shape[i - 1]
        if lane >= 128 and total // nxt < 8:
            break
        lane = nxt
        i -= 1
        if lane >= 1024:
            break
    return total // lane, lane


def _pick_block_2d(rows, lane, itemsize, max_block_bytes, want_steps=2):
    """(rt, lt) block for a (rows, lane) array: rt multiple of 8 (or full rows),
    lt multiple of 128 (or full lane), within the per-block byte budget."""
    if lane < 128:
        lt = lane
    else:
        row_floor = rows if rows < 8 else 8
        units = max(1, min(pl.cdiv(lane, 128),
                           max_block_bytes // (row_floor * 128 * itemsize)))
        lt = units * 128
    if rows <= 8:
        rt = rows
    else:
        rt_units = max(1, min(pl.cdiv(rows, 8),
                              max_block_bytes // (lt * 8 * itemsize)))
        rt = rt_units * 8
    # Ensure >= want_steps grid steps (megacore sharding on v7x).
    if (want_steps > 1 and pl.cdiv(rows, rt) * pl.cdiv(lane, lt) < want_steps
            and lane >= want_steps * 128):
        lt = max(128, pl.cdiv(pl.cdiv(lane, want_steps), 128) * 128)
    return rt, lt


# --------------------------------------------------------------------------
# Fast path: k-space (B, C, H, W, 2), mask (B, 1, H, W)
# --------------------------------------------------------------------------
def _dc_coil_broadcast(pred, samp, mask_hw):
    B, C, H, W, two = pred.shape
    L = two * H * W

    pred_f = pred.reshape(B, C, L)
    samp_f = samp.reshape(B, C, L)
    # Interleave the mask over the re/im pair once (small: B*L elements,
    # ~1/(2C) of one k-space read); in-kernel it broadcasts over the coil axis.
    mask_f = jnp.repeat(mask_hw.reshape(B, 1, H * W), 2, axis=-1).astype(pred.dtype)

    itemsize = pred.dtype.itemsize
    # 3 large streams (samp, pred, out), each double-buffered -> 6 big buffers.
    vmem_limit, max_block_bytes = _vmem_budget(num_block_buffers=6)
    padded_c = -(-C // 8) * 8  # sublane padding of a (1, C, lt) block
    lt = _pick_lane_tile(L, padded_c, itemsize, max_block_bytes,
                         min_lane_tiles=2 if B == 1 else 1)
    grid = (B, pl.cdiv(L, lt))

    cost = pl.CostEstimate(
        flops=3 * B * C * L,
        transcendentals=0,
        bytes_accessed=(3 * B * C * L + B * L) * itemsize,
    )

    out_f = pl.pallas_call(
        _dc_kernel,
        out_shape=jax.ShapeDtypeStruct((B, C, L), pred.dtype),
        grid=grid,
        in_specs=[
            pl.BlockSpec((1, 1, lt), lambda b, l: (b, 0, l)),  # mask (coil-bcast)
            pl.BlockSpec((1, C, lt), lambda b, l: (b, 0, l)),  # sampled k-space
            pl.BlockSpec((1, C, lt), lambda b, l: (b, 0, l)),  # predicted k-space
        ],
        out_specs=pl.BlockSpec((1, C, lt), lambda b, l: (b, 0, l)),
        compiler_params=pltpu.CompilerParams(
            dimension_semantics=("parallel", "parallel"),
            vmem_limit_bytes=vmem_limit,
        ),
        cost_estimate=cost,
    )(mask_f, samp_f, pred_f)

    return out_f.reshape(pred.shape)


# --------------------------------------------------------------------------
# Generic path: mask.shape == pred.shape (no broadcast materialization needed)
# --------------------------------------------------------------------------
def _dc_same_shape(pred, samp, mask):
    shape = pred.shape
    total = math.prod(shape)
    rows, lane = _factor_2d(shape)

    pred_f = pred.reshape(rows, lane)
    samp_f = samp.reshape(rows, lane)
    mask_f = mask.reshape(rows, lane).astype(pred.dtype)

    itemsize = pred.dtype.itemsize
    # 4 full-size streams (mask, samp, pred, out), double-buffered -> 8 buffers.
    vmem_limit, max_block_bytes = _vmem_budget(num_block_buffers=8)
    rt, lt = _pick_block_2d(rows, lane, itemsize, max_block_bytes)
    grid = (pl.cdiv(rows, rt), pl.cdiv(lane, lt))

    cost = pl.CostEstimate(
        flops=3 * total,
        transcendentals=0,
        bytes_accessed=4 * total * itemsize,
    )

    out_f = pl.pallas_call(
        _dc_kernel,
        out_shape=jax.ShapeDtypeStruct((rows, lane), pred.dtype),
        grid=grid,
        in_specs=[
            pl.BlockSpec((rt, lt), lambda r, l: (r, l)),
            pl.BlockSpec((rt, lt), lambda r, l: (r, l)),
            pl.BlockSpec((rt, lt), lambda r, l: (r, l)),
        ],
        out_specs=pl.BlockSpec((rt, lt), lambda r, l: (r, l)),
        compiler_params=pltpu.CompilerParams(
            dimension_semantics=("parallel", "parallel"),
            vmem_limit_bytes=vmem_limit,
        ),
        cost_estimate=cost,
    )(mask_f, samp_f, pred_f)

    return out_f.reshape(shape)


# --------------------------------------------------------------------------
# Public entry point (DataConsistencyLayer.forward)
# --------------------------------------------------------------------------
def data_consistency(pred_kspace, sampled_kspace, mask, sensitivity_maps=None):
    """Pallas implementation of DataConsistencyLayer.forward."""
    del sensitivity_maps  # unused in k-space DC (matches the torch module)
    assert pred_kspace.shape == sampled_kspace.shape
    pred, samp = pred_kspace, sampled_kspace

    if mask.ndim == 4 and pred.ndim == 5:
        B, C, H, W, two = pred.shape
        assert two == 2, "last k-space axis must be the re/im pair"
        if mask.shape == (B, 1, H, W):
            return _dc_coil_broadcast(pred, samp, mask)
        mask = mask[..., None]  # torch: mask.unsqueeze(-1)

    if mask.ndim == 5 and pred.ndim == 5:
        B, C, H, W, two = pred.shape
        if two == 2 and mask.shape == (B, 1, H, W, 1):
            return _dc_coil_broadcast(pred, samp, mask.reshape(B, 1, H, W))

    if mask.shape != pred.shape:
        # Rare broadcast patterns: materialize once (correct, not BW-optimal).
        mask = jnp.broadcast_to(mask, pred.shape)
    return _dc_same_shape(pred, samp, mask)


# --------------------------------------------------------------------------
# Self-test
# --------------------------------------------------------------------------
if __name__ == "__main__":
    key = jax.random.PRNGKey(0)
    k1, k2, k3 = jax.random.split(key, 3)

    B, C, H, W = 2, 4, 16, 16  # small shapes; complex axis = 2
    pred_kspace = jax.random.normal(k1, (B, C, H, W, 2), dtype=jnp.float32)
    sampled_kspace = jax.random.normal(k2, (B, C, H, W, 2), dtype=jnp.float32)
    mask = (jax.random.uniform(k3, (B, 1, H, W)) > 0.5).astype(jnp.float32)

    ref = mask[..., None] * sampled_kspace + (1.0 - mask[..., None]) * pred_kspace

    # 1) Main path: 4D mask + 5D k-space (the torch module's documented branch).
    out = jax.block_until_ready(data_consistency(pred_kspace, sampled_kspace, mask))
    assert out.shape == pred_kspace.shape
    assert jnp.allclose(out, ref, atol=1e-6, rtol=1e-6), "coil-broadcast (4D) mismatch"

    # 2) 5D mask (B,1,H,W,1): routed through the same coil-broadcast kernel.
    out5 = jax.block_until_ready(
        data_consistency(pred_kspace, sampled_kspace, mask[..., None]))
    assert jnp.allclose(out5, ref, atol=1e-6, rtol=1e-6), "coil-broadcast (5D) mismatch"

    # 3) Full same-shape mask: exercises the sublane-dense generic path.
    mask_full = jnp.broadcast_to(mask[..., None], pred_kspace.shape)
    outf = jax.block_until_ready(
        data_consistency(pred_kspace, sampled_kspace, mask_full))
    assert jnp.allclose(outf, ref, atol=1e-6, rtol=1e-6), "same-shape path mismatch"

    print("KERNEL_OK")
</pallas_src>

<mosaic_0001>
module attributes {stable_mosaic.version = 11 : i64} {
  func.func @_dc_kernel(%arg0: i32, %arg1: i32, %arg2: memref<1x1x512xf32, #tpu.memory_space<vmem>>, %arg3: memref<1x4x512xf32, #tpu.memory_space<vmem>>, %arg4: memref<1x4x512xf32, #tpu.memory_space<vmem>>, %arg5: memref<1x4x512xf32, #tpu.memory_space<vmem>>) attributes {dimension_semantics = [#tpu.dimension_semantics<parallel>, #tpu.dimension_semantics<parallel>], iteration_bounds = array<i64: 2, 1>, scalar_prefetch = 0 : i64, scratch_operands = 0 : i64, tpu.core_type = #tpu.core_type<tc>, window_params = [{transform_indices = @transform_0, window_bounds = array<i64: 1, 1, 512>}, {transform_indices = @transform_1, window_bounds = array<i64: 1, 4, 512>}, {transform_indices = @transform_2, window_bounds = array<i64: 1, 4, 512>}, {transform_indices = @transform_3, window_bounds = array<i64: 1, 4, 512>}]} {
    %c0 = arith.constant 0 : index
    %c0_0 = arith.constant 0 : index
    %c0_1 = arith.constant 0 : index
    %0 = vector.load %arg2[%c0, %c0_0, %c0_1] : memref<1x1x512xf32, #tpu.memory_space<vmem>>, vector<1x1x512xf32>
    %c0_2 = arith.constant 0 : index
    %c0_3 = arith.constant 0 : index
    %c0_4 = arith.constant 0 : index
    %1 = vector.load %arg3[%c0_2, %c0_3, %c0_4] : memref<1x4x512xf32, #tpu.memory_space<vmem>>, vector<1x4x512xf32>
    %2 = vector.broadcast %0 : vector<1x1x512xf32> to vector<1x4x512xf32>
    %3 = arith.mulf %2, %1 : vector<1x4x512xf32>
    %cst = arith.constant 1.000000e+00 : f32
    %4 = vector.broadcast %cst : f32 to vector<1x1x512xf32>
    %5 = arith.subf %4, %0 : vector<1x1x512xf32>
    %c0_5 = arith.constant 0 : index
    %c0_6 = arith.constant 0 : index
    %c0_7 = arith.constant 0 : index
    %6 = vector.load %arg4[%c0_5, %c0_6, %c0_7] : memref<1x4x512xf32, #tpu.memory_space<vmem>>, vector<1x4x512xf32>
    %7 = vector.broadcast %5 : vector<1x1x512xf32> to vector<1x4x512xf32>
    %8 = arith.mulf %7, %6 : vector<1x4x512xf32>
    %9 = arith.addf %3, %8 : vector<1x4x512xf32>
    %c0_8 = arith.constant 0 : index
    %c0_9 = arith.constant 0 : index
    %c0_10 = arith.constant 0 : index
    %10 = vector.load %arg5[%c0_8, %c0_9, %c0_10] : memref<1x4x512xf32, #tpu.memory_space<vmem>>, vector<1x4x512xf32>
    tpu.vector_store %arg5[%c0_8, %c0_9, %c0_10], %9 {strides = array<i32>} : memref<1x4x512xf32, #tpu.memory_space<vmem>>, vector<1x4x512xf32>,
    return
  }
  func.func @transform_0(%arg0: i32, %arg1: i32) -> (i32, i32, i32) {
    %c0_i32 = arith.constant 0 : i32
    %c0_i32_0 = arith.constant 0 : i32
    return %arg0, %c0_i32, %arg1 : i32, i32, i32
  }
  func.func @transform_1(%arg0: i32, %arg1: i32) -> (i32, i32, i32) {
    %c0_i32 = arith.constant 0 : i32
    %c0_i32_0 = arith.constant 0 : i32
    return %arg0, %c0_i32, %arg1 : i32, i32, i32
  }
  func.func @transform_2(%arg0: i32, %arg1: i32) -> (i32, i32, i32) {
    %c0_i32 = arith.constant 0 : i32
    %c0_i32_0 = arith.constant 0 : i32
    return %arg0, %c0_i32, %arg1 : i32, i32, i32
  }
  func.func @transform_3(%arg0: i32, %arg1: i32) -> (i32, i32, i32) {
    %c0_i32 = arith.constant 0 : i32
    %c0_i32_0 = arith.constant 0 : i32
    return %arg0, %c0_i32, %arg1 : i32, i32, i32
  }
}

</mosaic_0001>

<bundles_post_ra>
// kernel: tpu_custom_call.1
= control target key start
LH: loop header
LB: loop body
LE: loop exit
PB: predicated region body
PF: predicated region fallthrough
CT: control target
= control target key end

     0   :  { %s1019_s0 = inlined_call_operand.hbm [shape: f32[2,1,512], index: 0, kind: input, shape index: {}]   ;;  %s1020_s1 = inlined_call_operand.hbm [shape: f32[2,4,512], index: 1, kind: input, shape index: {}]   ;;  %s1021_s2 = inlined_call_operand.hbm [shape: f32[2,4,512], index: 2, kind: input, shape index: {}]   ;;  %s1022_s3 = inlined_call_operand.hbm [shape: f32[2,4,512], index: 3, kind: output, shape index: {}]  }
   0x1   :  { %1025 = sst [smem:[#allocation14_spill]] %s1020_s1 }
   0x2   :  { %1026 = sst [smem:[#allocation15_spill]] %s1021_s2 }
   0x3   :  { %8 = vsyncpa [#allocation3], 0 }
   0x4   :  { %10 = vsyncpa [#allocation3 + $0x1], 0 }
   0x5   :  { %11 = vsyncpa [#allocation6], 0 }
   0x6   :  { %13 = vsyncpa [#allocation6 + $0x1], 0 }
   0x7   :  { %14 = vsyncpa [#allocation4], 0 }
   0x8   :  { %16 = vsyncpa [#allocation4 + $0x1], 0  ;;  %s819_s12 = smov 0   ;;  %s821_s13 = smov 0  }
   0x9   :  { %s823_s14 = smov 0   ;;  %s825_s15 = smov 0  }
   0xa   :  { %s827_s16 = smov 0   ;;  %s829_s17 = smov 0  }
   0xb LB: > { %1027 = sst [smem:[#allocation12_spill]] %s789_s16  ;;  %s850_s18 = sadd.s32 4294967295, %s793_s17   ;;  %s793_s17 = sphi %s829_s17, %s22_s17   ;;  %s789_s16 = sphi %s827_s16, %s1039_s16   ;;  %s785_s15 = sphi %s825_s15, %s1038_s15   ;;  %s781_s14 = sphi %s823_s14, %s1042_s14   ;;  %s777_s13 = sphi %s821_s13, %s1041_s13   ;;  %s773_s12 = sphi %s819_s12, %s1040_s12  }
   0xc   : > { %s523_s19 = sadd.s32 4294967294, %s793_s17   ;;  %s34_s20 = sadd.s32 1, %s789_s16 }
   0xd   : > { %s43_s21 = sadd.s32 1, %s781_s14  ;;  %p36_p0 = scmp.ge.s32.totalorder %s34_s20, 2 }
   0xe   : > { %p50_p1 = scmp.ne.s32.totalorder %s781_s14, %s777_s13  ;;  %p51_p2 = scmp.eq.s32.totalorder %s793_s17, 0 }
   0xf   : > { %p56_p3 = scmp.ne.s32.totalorder %s777_s13, %s773_s12  ;;  %s1044_s20 = smov (%p36_p0, %s34_s20), 0 }
  0x10   : > { %1028 = sst [smem:[#allocation13_spill]] %s1044_s20  ;;  %p862_p4 = por %p51_p2, %p50_p1 }
  0x11   : > { %p57_p5 = scmp.eq.s32.totalorder %s850_s18, 0  ;;  %s38_s23 = ssub.s32 %s789_s16, %s1044_s20 }
  0x12   : > { %p138_p6 = scmp.eq.s32.totalorder %s850_s18, 1  ;;  %p41_p7 = scmp.eq.s32.totalorder %s38_s23, 0 }
  0x13   : > { %p870_p8 = por %p57_p5, %p56_p3  ;;  %p144_p10 = scmp.eq.s32.totalorder %s523_s19, 1 }
  0x14   : > { %p874_p9 = por %p138_p6, %p50_p1  ;;  %p571_p13 = scmp.lt.s32.totalorder %s793_s17, 2 }
  0x15   : > { %s879_s26 = scalar_select %p41_p7, %s781_s14, %s43_s21  }
  0x16   : > { %p881_p11 = por %p144_p10, %p56_p3  ;;  %s888_s28 = sand.u32 1, %s781_s14  }
  0x17   : > { %s185_s29 = sand.u32 1, %s793_s17   ;;  %s529_s30 = sshll.u32 %s888_s28, 4 }
  0x18   : > { %p894_p0 = pnand %p571_p13, %p862_p4  ;;  %s546_s5 = sshll.u32 %s789_s16, 8 }
  0x19   : > { %s1034_s1 = sld [smem:[#allocation14_spill]]  ;;  %s189_s9 = scalar_lea.vmem [#allocation5], %s529_s30 }
  0x1a   : > { %s199_s10 = sshll.u32 %s189_s9, 4  ;;  %s1035_s2 = sld [smem:[#allocation15_spill]]  ;;  %s200_s10 = int_to_ptr.vmem [resolvable:$true] %s199_s10 }
  0x1b   : > { %s909_s22 = scalar_lea.sflag [#allocation6], %s185_s29  ;;  %p627_p1 = pneg %p894_p0 }
  0x1c   : > { %s638_s23 = scalar_lea.vmem %s200_s10, 256  ;;  %s795_s6 = smov [#allocation5]  }
  0x1d   : > { %p639_p2 = scmp.ne.s32.totalorder %s200_s10, %s638_s23  ;;  %s643_s7 = sshll.u32 %s795_s6, 4  ;;  %s644_s7 = int_to_ptr.vmem [resolvable:$false] %s643_s7 }
  0x1e   : > { %s645_s9 = scalar_lea.vmem %s644_s7, 512  ;;  %p646_p5 = scmp.lt.s32.totalorder %s200_s10, %s644_s7 }
  0x1f   : > { %s197_s8 = scalar_lea.hbm %s1034_s1, %s546_s5  ;;  %p641_p3 = pnand %p639_p2, %p627_p1 }
  0x20   : > { %s907_s21 = scalar_lea.hbm %s1035_s2, %s546_s5  ;;  %p647_p6 = scmp.lt.s32.totalorder %s645_s9, %s638_s23 }
  0x21   : > { %p642_p4 = pneg %p641_p3 }
  0x22   : > { %p648_p7 = por %p647_p6, %p646_p5 }
  0x24   : > { %p649_p10 = pnand %p648_p7, %p642_p4 }
  0x26   : > { %652 = shalt.err (!%p649_p10)
}
  0x27   : > { %563 = dma.hbm_to_vmem [thread:$0]  (!%p894_p0), %s197_s8, 256, %s200_s10, %s909_s22  }
  0x28   : > { %p535_p13 = scmp.ge.s32.totalorder %s793_s17, 1  ;;  %p225_p2 = scmp.lt.s32.totalorder %s793_s17, 3 }
  0x29   : > { %s526_s5 = sshll.u32 %s888_s28, 2  ;;  %s545_s11 = sshll.u32 %s789_s16, 6 }
  0x2a   : > { %p921_p3 = pnand %p535_p13, %p225_p2  ;;  %s176_s6 = scalar_lea.hbm %s1019_s0, %s545_s11 }
  0x2b   : > { %s168_s7 = scalar_lea.vmem [#allocation2], %s526_s5  ;;  %s210_s1 = scalar_lea.vmem [#allocation7], %s529_s30 }
  0x2c   : > { %s178_s9 = sshll.u32 %s168_s7, 4  ;;  %s220_s2 = sshll.u32 %s210_s1, 4  ;;  %s179_s9 = int_to_ptr.vmem [resolvable:$true] %s178_s9  ;;  %s932_s2 = int_to_ptr.vmem [resolvable:$true] %s220_s2 }
  0x2d   : > { %s165_s8 = scalar_lea.sflag [#allocation3], %s888_s28  ;;  %s666_s10 = scalar_lea.vmem %s179_s9, 64 }
  0x2e   : > { %p667_p4 = scmp.ne.s32.totalorder %s179_s9, %s666_s10  ;;  %s796_s20 = smov [#allocation2]  }
  0x2f   : > { %s671_s16 = sshll.u32 %s796_s20, 4  ;;  %s672_s16 = int_to_ptr.vmem [resolvable:$false] %s671_s16 }
  0x30   : > { %p669_p5 = pnand %p667_p4, %p627_p1  ;;  %s673_s19 = scalar_lea.vmem %s672_s16, 128 }
  0x31   : > { %p674_p7 = scmp.lt.s32.totalorder %s179_s9, %s672_s16  ;;  %p675_p10 = scmp.lt.s32.totalorder %s673_s19, %s666_s10 }
  0x32   : > { %p670_p6 = pneg %p669_p5 }
  0x33   : > { %p676_p13 = por %p675_p10, %p674_p7 }
  0x35   : > { %p677_p2 = pnand %p676_p13, %p670_p6 }
  0x37   : > { %680 = shalt.err (!%p677_p2)
}
  0x38   : > { %560 = dma.hbm_to_vmem [thread:$0]  (!%p894_p0), %s176_s6, 64, %s179_s9, %s165_s8  }
  0x39   : > { %s694_s1 = scalar_lea.vmem %s932_s2, 256  ;;  %s797_s20 = smov [#allocation7]  }
  0x3a   : > { %p695_p12 = scmp.ne.s32.totalorder %s932_s2, %s694_s1  ;;  %s699_s28 = sshll.u32 %s797_s20, 4  ;;  %s700_s28 = int_to_ptr.vmem [resolvable:$false] %s699_s28 }
  0x3b   : > { %s701_s16 = scalar_lea.vmem %s700_s28, 512  ;;  %p702_p7 = scmp.lt.s32.totalorder %s932_s2, %s700_s28 }
  0x3c   : > { %p697_p4 = pnand %p695_p12, %p627_p1  ;;  %p703_p6 = scmp.lt.s32.totalorder %s701_s16, %s694_s1 }
  0x3e   : > { %p698_p5 = pneg %p697_p4  ;;  %p704_p10 = por %p703_p6, %p702_p7 }
  0x40   : > { %p705_p13 = pnand %p704_p10, %p698_p5 }
  0x42   : > { %708 = shalt.err (!%p705_p13)
}
  0x43   : > { %566 = dma.hbm_to_vmem [thread:$0]  (!%p894_p0), %s907_s21, 256, %s932_s2, %s909_s22  }
  0x44   : > { %229 = sbr.rel (%p921_p3) target bundleno = 105 (0x69), region = 32  ;;  %s954_s30 = sand.u32 (!%p921_p3), 1, %s777_s13  }
  0x45   : > { %s536_s5 = sshll.u32 (!%p921_p3), %s954_s30, 2  ;;  %s232_s11 = scalar_lea.sflag (!%p921_p3), [#allocation3], %s954_s30 }
  0x46   : > { %s235_s23 = scalar_lea.vmem (!%p921_p3), [#allocation2], %s536_s5 }
  0x49   : > { %760 = dma.done.wait (%p870_p8), %s232_s11, 64  }
  0x4a   : > { %762 = vsyncadd (%p870_p8), %s232_s11, 4294967232  ;;  %s240_s2 = sand.u32 1, %s850_s18   ;;  %s964_s4 = sshll.u32 %s954_s30, 4 }
  0x4b   : > { %s241_s21 = scalar_lea.sflag [#allocation6], %s240_s2  ;;  %s244_s22 = scalar_lea.vmem [#allocation5], %s964_s4 }
  0x4c   : > { %764 = dma.done.wait (%p870_p8), %s241_s21, 512  }
  0x4d   : > { %766 = vsyncadd (%p870_p8), %s241_s21, 4294966784  ;;  %v294_v0 = vlaneseq  ;;  %v290_v6 = vld [vmem:[%s235_s23] sm:$0xf]  ;;  %v291_v7 = vld [vmem:[%s244_s22] sm:$0xff]  ;;  %s253_s18 = scalar_lea.vmem [#allocation7], %s964_s4  ;;  %s285_s24 = scalar_lea.vmem [#allocation8], %s964_s4 }
  0x4e   : > { %v325_v8 = vld [vmem:[%s253_s18] sm:$0xff]  ;;  %v316_v11 = vcombine.high %v291_v7, %v291_v7  ;;  %v324_v12 = vsub.f32 1.0, %v290_v6  ;;  %v292_v13 = vld [vmem:[%s244_s22 + $0x8] sm:$0xff]  ;;  %s389_s29 = sshll.u32 %s285_s24, 4  ;;  %s548_s6 = sshll.u32 %s785_s15, 8  ;;  %s974_s29 = int_to_ptr.vmem [resolvable:$true] %s389_s29 }
  0x4f   : > { %v295_v1 = vshrl.u32 %v294_v0, 7  ;;  %v350_v14 = vcombine.high %v325_v8, %v325_v8  ;;  %v317_v17 = vcombine.high %v292_v13, %v292_v13  ;;  %v326_v18 = vld [vmem:[%s253_s18 + $0x8] sm:$0xff]  ;;  %s387_s8 = scalar_lea.hbm %s1022_s3, %s548_s6  ;;  %s373_s10 = scalar_lea.sflag [#allocation4], %s954_s30 }
  0x50   : > { %v351_v29 = vcombine.high %v326_v18, %v326_v18  ;;  %s709_s19 = scalar_lea.vmem %s974_s29, 256  ;;  %s798_s15 = smov [#allocation8]  }
  0x51   : > { %v296_v2 = vsub.s32 0, %v295_v1  ;;  %v300_v3 = vsub.s32 1, %v295_v1  ;;  %v304_v4 = vsub.s32 2, %v295_v1  ;;  %v308_v5 = vsub.s32 3, %v295_v1  ;;  %p710_p8 = scmp.ne.s32.totalorder %s974_s29, %s709_s19  ;;  %s713_s1 = sshll.u32 %s798_s15, 4  ;;  %s714_s1 = int_to_ptr.vmem [resolvable:$false] %s713_s1 }
  0x52   : > { %s715_s20 = scalar_lea.vmem %s714_s1, 512  ;;  %p716_p1 = scmp.lt.s32.totalorder %s974_s29, %s714_s1 }
  0x53   : > { %v297_v9 = vrot.slane %v290_v6, %v296_v2  ;;  %v301_v10 = vrot.slane %v290_v6, %v300_v3  ;;  %v305_v15 = vrot.slane %v290_v6, %v304_v4  ;;  %v309_v16 = vrot.slane %v290_v6, %v308_v5  ;;  %p711_p12 = pnand %p710_p8, %p874_p9  ;;  %p717_p3 = scmp.lt.s32.totalorder %s715_s20, %s709_s19 }
  0x54   : > { %v331_v21 = vrot.slane %v324_v12, %v296_v2  ;;  %v335_v22 = vrot.slane %v324_v12, %v300_v3  ;;  %v339_v24 = vrot.slane %v324_v12, %v304_v4  ;;  %v343_v25 = vrot.slane %v324_v12, %v308_v5 }
  0x55   : > { %v320_v19 = vmul.f32 %v297_v9, %v291_v7  ;;  %v321_v20 = vmul.f32 %v316_v11, %v301_v10  ;;  %v322_v23 = vmul.f32 %v305_v15, %v292_v13  ;;  %v323_v28 = vmul.f32 %v317_v17, %v309_v16  ;;  %p712_p0 = pneg %p711_p12  ;;  %p718_p2 = por %p717_p3, %p716_p1 }
  0x56   : > { %v354_v26 = vmul.f32 %v331_v21, %v325_v8  ;;  %v355_v27 = vmul.f32 %v350_v14, %v335_v22  ;;  %v356_v30 = vmul.f32 %v339_v24, %v326_v18  ;;  %v357_v33 = vmul.f32 %v351_v29, %v343_v25 }
  0x57   : > { %p719_p4 = pnand %p718_p2, %p712_p0 }
  0x58   : > { %v358_v31 = vadd.f32 %v354_v26, %v320_v19  ;;  %v359_v32 = vadd.f32 %v355_v27, %v321_v20  ;;  %v360_v34 = vadd.f32 %v356_v30, %v322_v23  ;;  %v361_v36 = vadd.f32 %v357_v33, %v323_v28 }
  0x5a   : > { %v366_v35 = vcombine.low %v358_v31, %v359_v32  ;;  %v367_v37 = vcombine.low %v360_v34, %v361_v36 }
  0x5c   : > { %370 = vst [vmem:[%s285_s24] sm:$0xff] %v366_v35  ;;  %371 = vst [vmem:[%s285_s24 + $0x8] sm:$0xff] %v367_v37 }
  0x5d   : > { %722 = shalt.err (!%p719_p4)
}
  0x5e   : > { %s723_s28 = scalar_lea.hbm %s387_s8, 256  ;;  %s727_s5 = scalar_lea.hbm %s1022_s3, 512 }
  0x5f   : > { %p724_p5 = scmp.ne.s32.totalorder %s387_s8, %s723_s28  ;;  %p728_p10 = scmp.lt.s32.totalorder %s387_s8, %s1022_s3 }
  0x60   : > { %p729_p13 = scmp.lt.s32.totalorder %s727_s5, %s723_s28 }
  0x61   : > { %p725_p7 = pnand %p724_p5, %p874_p9 }
  0x62   : > { %p730_p8 = por %p729_p13, %p728_p10 }
  0x63   : > { %p726_p6 = pneg %p725_p7 }
  0x65   : > { %p731_p12 = pnand %p730_p8, %p726_p6 }
  0x67   : > { %734 = shalt.err (!%p731_p12)
}
  0x68   : > { %555 = dma.vmem_to_hbm [thread:$0]  (%p874_p9), %s974_s29, 256, %s387_s8, %s373_s10  }
  0x69 PF: > { %s401_s2 = sand.u32 1, %s773_s12   ;;  %p1037_p0 = scmp.ge.s32.totalorder %s793_s17, 2 }
  0x6a   : > { %s402_s4 = scalar_lea.sflag [#allocation4], %s401_s2 }
  0x6b   : > { %p568_p1 = pnand %p1037_p0, %p881_p11 }
  0x6d   : > { %p569_p3 = pneg %p568_p1 }
  0x6f   : > { %768 = dma.done.wait (%p569_p3), %s402_s4, 256  }
  0x70   : > { %770 = vsyncadd (%p569_p3), %s402_s4, 4294967040  ;;  %s22_s17 = sadd.s32 1, %s793_s17   ;;  %s1038_s15 = sld [smem:[#allocation12_spill]] }
  0x71   : > { %p19_p2 = scmp.ge.s32.totalorder %s22_s17, 4   ;;  %s1039_s16 = sld [smem:[#allocation13_spill]] }
  0x72   : > { %s1040_s12 = smov %s777_s13  ;;  %s1041_s13 = smov %s781_s14 }
  0x73   : > { %s1042_s14 = smov %s879_s26  ;;  %21 = sbr.rel (!%p19_p2) target bundleno = 11 (0xb), region = 101 }
  0x78   :  { %407 = vsyncpa [#allocation3], 1 }
  0x79   :  { %409 = vsyncpa [#allocation3 + $0x1], 1 }
  0x7a   :  { %410 = vsyncpa [#allocation6], 1 }
  0x7b   :  { %412 = vsyncpa [#allocation6 + $0x1], 1 }
  0x7c   :  { %413 = vsyncpa [#allocation4], 1 }
  0x7d   :  { %415 = vsyncpa [#allocation4 + $0x1], 1 }

</bundles_post_ra>
